<compile_context>
chip_gen: v6e
topology: v6e:2x2x1
jax: 0.10.0
libtpu: 0.0.40
codegen_flags: <defaults>
</compile_context>

<pallas_src>
import jax
import jax.numpy as jnp
from jax.experimental import pallas as pl
from jax.experimental.pallas import tpu as pltpu

LANE = 128


def _chip_config():
    """Chip-aware tuning knobs. Conservative (v5e-like) defaults on unknown HW."""
    kind = ""
    try:
        kind = jax.devices()[0].device_kind.lower()
    except Exception:
        pass
    cfg = {
        "target_block_bytes": 2 << 20,   # ~2 MiB per buffer
        "vmem_limit_bytes": None,        # keep scoped-VMEM default
        "num_tc": 1,
        "bf16_native": False,            # v5e has no bf16 VPU/EUP
    }
    if "7x" in kind or "v7" in kind:     # v7x: 2 TCs, 3.2 TB/s HBM, 64 MiB VMEM/TC
        cfg.update(target_block_bytes=8 << 20,
                   vmem_limit_bytes=48 << 20,
                   num_tc=2,
                   bf16_native=True)
    elif "v6" in kind:                   # v6e: 1 TC, 32 MiB scoped default
        cfg.update(target_block_bytes=4 << 20,
                   bf16_native=True)
    return cfg


_CFG = _chip_config()


def _make_kernel(compute_dtype):
    def _adaptive_sigmoid_kernel(params_ref, x_ref, o_ref):
        # params_ref lives in SMEM; params_ref[0] is the learnable sigma scalar (f32).
        sigma = params_ref[0].astype(compute_dtype)
        x = x_ref[...].astype(compute_dtype)          # no-op when dtypes match
        # sigmoid(sigma * x) via a single tanh (one EUP op + trivial VPU work).
        y = 0.5 * jnp.tanh(0.5 * sigma * x) + 0.5
        o_ref[...] = y.astype(o_ref.dtype)            # write back in native dtype
    return _adaptive_sigmoid_kernel


def _run_kernel_flat(flat, params_f32):
    """Run the Pallas kernel on a flat array whose length is a multiple of 128."""
    n = flat.shape[0]
    dtype = flat.dtype
    itemsize = jnp.dtype(dtype).itemsize

    # Widest lane-dense last dim that divides n exactly (no padding pass).
    lanes = LANE
    for cand in (1024, 512, 256, LANE):
        if n % cand == 0:
            lanes = cand
            break
    rows = n // lanes
    x2 = flat.reshape(rows, lanes)

    # Block sizing in the input's native dtype.
    block_rows = max(8, (_CFG["target_block_bytes"] // (lanes * itemsize)) // 8 * 8)
    total_bytes = n * itemsize
    if _CFG["num_tc"] > 1 and total_bytes > (1 << 20):
        # Ensure >= num_tc grid steps so the 'parallel' axis shards across TCs (v7x).
        max_block_rows = max(8, (rows // _CFG["num_tc"]) // 8 * 8)
        block_rows = min(block_rows, max_block_rows)
    block_rows = min(block_rows, rows)
    grid = pl.cdiv(rows, block_rows)     # ragged tail block handled by Pallas masking

    # bf16-native math on v6e/v7x; f32 math otherwise.
    if _CFG["bf16_native"] and dtype == jnp.bfloat16:
        compute_dtype = jnp.bfloat16
    else:
        compute_dtype = jnp.float32

    out2 = pl.pallas_call(
        _make_kernel(compute_dtype),
        out_shape=jax.ShapeDtypeStruct((rows, lanes), dtype),
        grid=(grid,),
        in_specs=[
            pl.BlockSpec(memory_space=pltpu.SMEM),                  # sigma (scalar)
            pl.BlockSpec((block_rows, lanes), lambda i: (i, 0)),    # x tile
        ],
        out_specs=pl.BlockSpec((block_rows, lanes), lambda i: (i, 0)),
        compiler_params=pltpu.CompilerParams(
            dimension_semantics=("parallel",),
            vmem_limit_bytes=_CFG["vmem_limit_bytes"],
        ),
        cost_estimate=pl.CostEstimate(
            flops=4 * n,
            transcendentals=n,
            bytes_accessed=2 * n * itemsize,
        ),
    )(params_f32, x2)

    return out2.reshape(-1)


def adaptive_sigmoid_forward(x, params):
    """Elementwise adaptive sigmoid: 1 / (1 + exp(-params[0] * x)).

    x:      any-shape float array (NCHW in the reference module), any float dtype.
    params: shape (1,) learnable sigma.
    """
    orig_shape = x.shape
    dtype = x.dtype
    params_f32 = params.astype(jnp.float32)

    flat = x.reshape(-1)
    n = flat.shape[0]
    rem = n % LANE

    if rem == 0:
        return _run_kernel_flat(flat, params_f32).reshape(orig_shape)

    # Ragged path (rare): kernel on the aligned prefix, plain jnp on the <128-elem
    # tail. Avoids the pad + slice full-array HBM round-trips of the naive approach.
    n_main = n - rem
    sigma = params_f32[0]
    tail = flat[n_main:]
    tail_out = (0.5 * jnp.tanh(0.5 * sigma * tail.astype(jnp.float32)) + 0.5).astype(dtype)
    if n_main == 0:
        return tail_out.reshape(orig_shape)
    main_out = _run_kernel_flat(flat[:n_main], params_f32)
    return jnp.concatenate([main_out, tail_out]).reshape(orig_shape)


class AdaptiveSigmoid:
    """JAX/Pallas port of the PyTorch AdaptiveSigmoid module (forward only)."""

    def __init__(self, sigma, updates_signal):
        # nn.Parameter(torch.FloatTensor(sigma)) -> learnable vector, here shape (1,)
        self.params = jnp.asarray(sigma, dtype=jnp.float32)
        self.updates_signal = updates_signal  # backward-only flag; unused in forward

    def __call__(self, x):
        return adaptive_sigmoid_forward(x, self.params)


if __name__ == "__main__":
    key = jax.random.PRNGKey(0)
    module = AdaptiveSigmoid(sigma=[1.5], updates_signal=(True, True))

    # Main NCHW f32 case: (B=2, C=4, H=16, W=16) -> 2048 elements (multiple of 128).
    x = jax.random.normal(key, (2, 4, 16, 16), dtype=jnp.float32)
    y = jax.block_until_ready(module(x))
    ref = 1.0 / (1.0 + jnp.exp(-1.5 * x))
    assert y.shape == x.shape and y.dtype == x.dtype
    assert jnp.allclose(y, ref, atol=1e-5, rtol=1e-5)

    # Odd element count -> exercises the (rare) aligned-prefix + jnp-tail fallback.
    k2 = jax.random.PRNGKey(1)
    x_odd = jax.random.normal(k2, (2, 3, 7, 5), dtype=jnp.float32)
    y_odd = jax.block_until_ready(module(x_odd))
    ref_odd = 1.0 / (1.0 + jnp.exp(-1.5 * x_odd))
    assert y_odd.shape == x_odd.shape and y_odd.dtype == x_odd.dtype
    assert jnp.allclose(y_odd, ref_odd, atol=1e-5, rtol=1e-5)

    # bf16 input: native dtype through HBM; bf16-native math on v6e/v7x, f32 on v5e.
    x_bf = x.astype(jnp.bfloat16)
    y_bf = jax.block_until_ready(module(x_bf))
    ref_bf = (1.0 / (1.0 + jnp.exp(-1.5 * x_bf.astype(jnp.float32)))).astype(jnp.bfloat16)
    assert y_bf.shape == x_bf.shape and y_bf.dtype == jnp.bfloat16
    assert jnp.allclose(y_bf.astype(jnp.float32), ref_bf.astype(jnp.float32),
                        atol=1e-2, rtol=1e-2)

    # Larger case to exercise multi-step grid (and the v7x >=2-steps path).
    k3 = jax.random.PRNGKey(2)
    x_big = jax.random.normal(k3, (8, 16, 64, 64), dtype=jnp.float32)  # 512K elems
    y_big = jax.block_until_ready(module(x_big))
    ref_big = 1.0 / (1.0 + jnp.exp(-1.5 * x_big))
    assert jnp.allclose(y_big, ref_big, atol=1e-5, rtol=1e-5)

    print("KERNEL_OK")
</pallas_src>

<mosaic_0001>
module attributes {stable_mosaic.version = 11 : i64} {
  func.func @_adaptive_sigmoid_kernel(%arg0: i32, %arg1: memref<1xf32, #tpu.memory_space<smem>>, %arg2: memref<2x1024xf32, #tpu.memory_space<vmem>>, %arg3: memref<2x1024xf32, #tpu.memory_space<vmem>>) attributes {dimension_semantics = [#tpu.dimension_semantics<parallel>], iteration_bounds = array<i64: 1>, scalar_prefetch = 0 : i64, scratch_operands = 0 : i64, tpu.core_type = #tpu.core_type<tc>, window_params = [{transform_indices = @transform_0, window_bounds = array<i64: 1>}, {transform_indices = @transform_1, window_bounds = array<i64: 2, 1024>}, {transform_indices = @transform_2, window_bounds = array<i64: 2, 1024>}]} {
    %c0 = arith.constant 0 : index
    %0 = memref.load %arg1[%c0] : memref<1xf32, #tpu.memory_space<smem>>
    %c0_0 = arith.constant 0 : index
    %c0_1 = arith.constant 0 : index
    %1 = vector.load %arg2[%c0_0, %c0_1] : memref<2x1024xf32, #tpu.memory_space<vmem>>, vector<2x1024xf32>
    %cst = arith.constant 5.000000e-01 : f32
    %2 = arith.mulf %cst, %0 : f32
    %3 = vector.broadcast %2 : f32 to vector<2x1024xf32>
    %4 = arith.mulf %3, %1 : vector<2x1024xf32>
    %5 = math.tanh %4 : vector<2x1024xf32>
    %cst_2 = arith.constant 5.000000e-01 : f32
    %6 = vector.broadcast %cst_2 : f32 to vector<2x1024xf32>
    %7 = arith.mulf %6, %5 : vector<2x1024xf32>
    %cst_3 = arith.constant 5.000000e-01 : f32
    %8 = vector.broadcast %cst_3 : f32 to vector<2x1024xf32>
    %9 = arith.addf %7, %8 : vector<2x1024xf32>
    %c0_4 = arith.constant 0 : index
    %c0_5 = arith.constant 0 : index
    %10 = vector.load %arg3[%c0_4, %c0_5] : memref<2x1024xf32, #tpu.memory_space<vmem>>, vector<2x1024xf32>
    tpu.vector_store %arg3[%c0_4, %c0_5], %9 {strides = array<i32>} : memref<2x1024xf32, #tpu.memory_space<vmem>>, vector<2x1024xf32>,
    return
  }
  func.func @transform_0(%arg0: i32) -> i32 {
    %c0_i32 = arith.constant 0 : i32
    %c0_i32_0 = arith.constant 0 : i32
    return %c0_i32 : i32
  }
  func.func @transform_1(%arg0: i32) -> (i32, i32) {
    %c0_i32 = arith.constant 0 : i32
    %c0_i32_0 = arith.constant 0 : i32
    return %arg0, %c0_i32 : i32, i32
  }
  func.func @transform_2(%arg0: i32) -> (i32, i32) {
    %c0_i32 = arith.constant 0 : i32
    %c0_i32_0 = arith.constant 0 : i32
    return %arg0, %c0_i32 : i32, i32
  }
}

</mosaic_0001>

<bundles_post_ra>
// kernel: tpu_custom_call.1
= control target key start
LH: loop header
LB: loop body
LE: loop exit
PB: predicated region body
PF: predicated region fallthrough
CT: control target
= control target key end

     0   :  { %8 = vsyncpa [#allocation4], 0  ;;  %s131_s0 = inlined_call_operand.<no memory space> [shape: f32[1], index: 0, kind: input, shape index: {}]   ;;  %s132_s1 = inlined_call_operand.hbm [shape: f32[2,1024], index: 1, kind: input, shape index: {}]   ;;  %s133_s2 = inlined_call_operand.hbm [shape: f32[2,1024], index: 2, kind: output, shape index: {}]  }
   0x1   :  { %9 = vsyncpa [#allocation5], 0  ;;  %s105_s9 = smov [#allocation3]  }
   0x2   :  { %s18_s10 = sshll.u32 %s105_s9, 4  ;;  %s19_s10 = int_to_ptr.vmem [resolvable:$true] %s18_s10 }
   0x3   :  { %s69_s11 = scalar_lea.vmem %s19_s10, 256  ;;  %p74_p1 = scmp.lt.s32.totalorder %s19_s10, %s19_s10 }
   0x4   :  { %p70_p0 = scmp.ne.s32.totalorder %s19_s10, %s69_s11  ;;  %p75_p2 = scmp.lt.s32.totalorder %s69_s11, %s69_s11 }
   0x6   :  { %p76_p3 = por %p75_p2, %p74_p1 }
   0x8   :  { %p77_p4 = pnand %p76_p3, %p70_p0 }
   0xa   :  { %80 = shalt.err (!%p77_p4)
}
   0xb   :  { %21 = dma.hbm_to_vmem [thread:$0]  %s132_s1, 256, %s19_s10, [#allocation4]  }
   0xc   :  { %101 = dma.done.wait [#allocation4], 256  }
   0xd   :  { %102 = vsyncadd [#allocation4], 4294967040  ;;  %s28_s16 = smul.f32 0.5, %s131_s0  ;;  %v26_v1 = vld [vmem:[#allocation3] sm:$0xff]  ;;  %v27_v2 = vld [vmem:[#allocation3 + $0x8] sm:$0xff]  ;;  %s106_s17 = smov [#allocation6]  }
   0xe   :  { %s46_s18 = sshll.u32 %s106_s17, 4  ;;  %s47_s18 = int_to_ptr.vmem [resolvable:$true] %s46_s18 }
   0xf   :  { %v29_v0 = vstv %s28_s16  ;;  %s81_s1 = scalar_lea.vmem %s47_s18, 256  ;;  %p86_p6 = scmp.lt.s32.totalorder %s47_s18, %s47_s18 }
  0x10   :  { %v30_v3 = vmul.f32 %v29_v0, %v26_v1  ;;  %v31_v4 = vmul.f32 %v29_v0, %v27_v2  ;;  %p82_p5 = scmp.ne.s32.totalorder %s47_s18, %s81_s1  ;;  %p87_p7 = scmp.lt.s32.totalorder %s81_s1, %s81_s1 }
  0x12   :  { %57 = vtanh.f32 %v30_v3  ;;  %p88_p8 = por %p87_p7, %p86_p6 }
  0x13   :  { %59 = vtanh.f32 %v31_v4 }
  0x14   :  { %p89_p9 = pnand %p88_p8, %p82_p5 }
  0x1f   :  { %v58_v5 = vpop.eup %57 }
  0x20   :  { %v60_v6 = vpop.eup %59  ;;  %v34_v7 = vmul.f32 0.5, %v58_v5 }
  0x21   :  { %v35_v8 = vmul.f32 0.5, %v60_v6 }
  0x22   :  { %v36_v9 = vadd.f32 0.5, %v34_v7 }
  0x23   :  { %v37_v10 = vadd.f32 0.5, %v35_v8 }
  0x24   :  { %38 = vst [vmem:[#allocation6] sm:$0xff] %v36_v9 }
  0x25   :  { %39 = vst [vmem:[#allocation6 + $0x8] sm:$0xff] %v37_v10 }
  0x26   :  { %92 = shalt.err (!%p89_p9)
}
  0x27   :  { %49 = dma.vmem_to_hbm [thread:$0]  %s47_s18, 256, %s133_s2, [#allocation5]  }
  0x28   :  { %103 = dma.done.wait [#allocation5], 256  }
  0x29   :  { %104 = vsyncadd [#allocation5], 4294967040 }
  0x2a   :  { %53 = vsyncpa [#allocation4], 1 }
  0x2b   :  { %54 = vsyncpa [#allocation5], 1 }

</bundles_post_ra>
